<compile_context>
chip_gen: v7x
topology: tpu7x:2x2x1
jax: 0.10.0
libtpu: 0.0.40
codegen_flags: <defaults>
</compile_context>

<pallas_src>
import functools

import jax
import jax.numpy as jnp
from jax import lax
from jax.experimental import pallas as pl
from jax.experimental.pallas import tpu as pltpu

_MIB = 1024 * 1024


def _pick_tile(dim, align, max_tile):
    """Largest multiple of `align` dividing `dim`, <= max_tile.

    Falls back to the full dimension (always a legal TPU block shape)."""
    if dim <= max_tile or dim % align != 0:
        return dim
    best = align
    t = align
    while t <= max_tile:
        if dim % t == 0:
            best = t
        t += align
    return best


def _largest_divisor_leq(n, cap):
    cap = max(1, min(n, cap))
    for d in range(cap, 0, -1):
        if n % d == 0:
            return d
    return 1


def _vmem_limit(est_bytes):
    # Never below the 32 MiB scoped default, 2x headroom over our accounting,
    # never above v7x's 64 MiB physical VMEM.
    return int(min(64 * _MIB, max(32 * _MIB, 2 * est_bytes)))


# ----------------------------------------------------------------------------
# Pass 1: spatial max+sum pooling (lane-resident accumulation) + MLP epilogue.
# ----------------------------------------------------------------------------
def _cam_pool_mlp_kernel(x_ref, w1t_ref, b1_ref, w2t_ref, b2x2_ref, att_ref,
                         max_acc, sum_acc, *, inv_hw, neg_slope, l_valid,
                         needs_mask):
    k = pl.program_id(1)
    nl = pl.num_programs(1)
    tb, C, tl = x_ref.shape

    @pl.when(k == 0)
    def _init():
        max_acc[...] = jnp.full(max_acc.shape, -jnp.inf, dtype=max_acc.dtype)
        sum_acc[...] = jnp.zeros(sum_acc.shape, dtype=sum_acc.dtype)

    # Elementwise (VPU) accumulation over 128-aligned lane slices of the block;
    # the cross-lane (XLU) reduction happens only once, in the epilogue below.
    blk = x_ref[...]                                 # (tb, C, tl), input dtype
    m = max_acc[...]
    s = sum_acc[...]
    if needs_mask:
        lane = lax.broadcasted_iota(jnp.int32, (tb, C, 128), 2)
        base = k * tl
    for c0 in range(0, tl, 128):
        chunk = blk[:, :, c0:c0 + 128]               # 128-aligned slice (view)
        if needs_mask:
            valid = (base + c0 + lane) < l_valid
            mchunk = jnp.where(valid, chunk, jnp.asarray(-jnp.inf, chunk.dtype))
        else:
            mchunk = chunk
        m = jnp.maximum(m, mchunk)                   # exact in input dtype
        s = s + chunk.astype(jnp.float32)            # zero pad is sum-neutral
    max_acc[...] = m
    sum_acc[...] = s

    @pl.when(k == nl - 1)
    def _epilogue():
        pooled_max = jnp.max(max_acc[...].astype(jnp.float32), axis=-1)  # (tb,C)
        pooled_avg = jnp.sum(sum_acc[...], axis=-1) * inv_hw             # (tb,C)
        # Row-stacked [max; avg] -> one matmul pair through the shared MLP.
        pooled = jnp.concatenate([pooled_max, pooled_avg], axis=0)       # (2tb,C)
        h = jnp.dot(pooled, w1t_ref[...],
                    preferred_element_type=jnp.float32) + b1_ref[...]
        h = jnp.where(h > 0, h, neg_slope * h)                           # LeakyReLU
        hsum = h[:tb] + h[tb:]                                           # (tb,hid)
        logits = jnp.dot(hsum, w2t_ref[...],
                         preferred_element_type=jnp.float32) + b2x2_ref[...]
        att_ref[0] = jax.nn.sigmoid(logits)                              # (tb,C)


# ----------------------------------------------------------------------------
# Pass 2: channel-wise rescale, streamed over lane-dense (B*C, L) tiles.
# ----------------------------------------------------------------------------
def _cam_rescale_kernel(att_ref, x_ref, o_ref):
    # att already cast to x dtype in the wrapper -> multiply stays in x dtype.
    o_ref[...] = x_ref[...] * att_ref[...]


def cam_forward(x, w1, b1, w2, b2, *, relu_a=0.01, ret_att=False):
    """x: (B, C, H, W). w1: (C//r, C), b1: (C//r,), w2: (C, C//r), b2: (C,)."""
    B, C, H, W = x.shape
    hid = w1.shape[0]
    L = H * W
    N = B * C
    x_item = x.dtype.itemsize

    # ---- weight prep (plain JAX, off the streaming path) -------------------
    w1t = jnp.transpose(w1).astype(jnp.float32)            # (C, hid)
    b1r = b1.reshape(1, hid).astype(jnp.float32)           # (1, hid)
    w2t = jnp.transpose(w2).astype(jnp.float32)            # (hid, C)
    b2x2 = (2.0 * b2).reshape(1, C).astype(jnp.float32)    # b2 appears twice

    # ---- lane padding so the spatial axis is always 128-aligned ------------
    L_pad = ((L + 127) // 128) * 128
    pad = L_pad - L
    x3d = x.reshape(B, C, L)
    if pad:
        x3d = jnp.pad(x3d, ((0, 0), (0, 0), (0, pad)))     # zeros

    # ---- pass 1 tiling: ~4 MiB x blocks, >= 2 batch tiles when possible ----
    tl_cap = max(512, ((4 * _MIB) // max(C * x_item, 1)) // 128 * 128)
    tl = _pick_tile(L_pad, 128, min(2048, tl_cap))
    nl = L_pad // tl
    rows_cap = max(1, (4 * _MIB) // (C * tl * x_item))
    tb_cap = rows_cap if B == 1 else min(rows_cap, max(1, B // 2))
    tb = _largest_divisor_leq(B, tb_cap)
    nb = B // tb

    wbytes = 4 * (w1t.size + b1r.size + w2t.size + b2x2.size)
    est1 = (2 * tb * C * tl * x_item            # double-buffered x block
            + 2 * wbytes                        # double-buffered weights
            + 2 * tb * C * 4                    # output block
            + tb * C * 128 * (x_item + 4))      # accumulator scratch

    att3 = pl.pallas_call(
        functools.partial(_cam_pool_mlp_kernel,
                          inv_hw=1.0 / float(L), neg_slope=float(relu_a),
                          l_valid=L, needs_mask=(pad > 0)),
        out_shape=jax.ShapeDtypeStruct((nb, tb, C), jnp.float32),
        grid=(nb, nl),
        in_specs=[
            pl.BlockSpec((tb, C, tl), lambda b, k: (b, 0, k)),
            pl.BlockSpec((C, hid), lambda b, k: (0, 0)),
            pl.BlockSpec((1, hid), lambda b, k: (0, 0)),
            pl.BlockSpec((hid, C), lambda b, k: (0, 0)),
            pl.BlockSpec((1, C), lambda b, k: (0, 0)),
        ],
        out_specs=pl.BlockSpec((1, tb, C), lambda b, k: (b, 0, 0)),
        scratch_shapes=[pltpu.VMEM((tb, C, 128), x.dtype),     # running max
                        pltpu.VMEM((tb, C, 128), jnp.float32)],  # running sum
        compiler_params=pltpu.CompilerParams(
            dimension_semantics=("parallel", "arbitrary"),
            vmem_limit_bytes=_vmem_limit(est1)),
    )(x3d, w1t, b1r, w2t, b2x2)
    att = att3.reshape(B, C)

    # ---- pass 2: channel-wise rescale, lane-dense streaming ----------------
    x2d = x3d.reshape(N, L_pad)
    att_col = att.reshape(N, 1).astype(x.dtype)
    tl2 = _pick_tile(L_pad, 128, 4096)
    tn_cap = max(8, min(512, (4 * _MIB) // (tl2 * x_item)))
    tn = _pick_tile(N, 8, tn_cap)

    est2 = 4 * tn * tl2 * x_item + 2 * tn * 128 * x_item
    out2d = pl.pallas_call(
        _cam_rescale_kernel,
        out_shape=jax.ShapeDtypeStruct((N, L_pad), x.dtype),
        grid=(N // tn, L_pad // tl2),
        in_specs=[
            # Tiny attention column: the block index only depends on i, so
            # Pallas re-fetches it once per row tile, not every grid step.
            pl.BlockSpec((tn, 1), lambda i, j: (i, 0)),
            pl.BlockSpec((tn, tl2), lambda i, j: (i, j)),
        ],
        out_specs=pl.BlockSpec((tn, tl2), lambda i, j: (i, j)),
        compiler_params=pltpu.CompilerParams(
            dimension_semantics=("parallel", "parallel"),
            vmem_limit_bytes=_vmem_limit(est2)),
    )(att_col, x2d)

    out = out2d[:, :L] if pad else out2d
    out = out.reshape(B, C, H, W)
    if ret_att:
        return att.reshape(B, C, 1, 1).astype(x.dtype), out
    return out


def reference_cam(x, w1, b1, w2, b2, relu_a=0.01):
    """Plain-JAX reference mirroring the PyTorch forward."""
    max_out = jnp.max(jnp.max(x, axis=2), axis=-1)
    avg_out = jnp.mean(jnp.mean(x, axis=2), axis=-1)

    def mlp(v):
        h = v @ w1.T + b1
        h = jnp.where(h > 0, h, relu_a * h)
        return h @ w2.T + b2

    att = jax.nn.sigmoid(mlp(max_out) + mlp(avg_out))
    return att[:, :, None, None] * x


if __name__ == "__main__":
    key = jax.random.PRNGKey(0)
    B, C, H, W = 2, 4, 16, 16
    r = 2
    hid = C // r

    k_x, k_w1, k_b1, k_w2, k_b2 = jax.random.split(key, 5)
    x = jax.random.normal(k_x, (B, C, H, W), dtype=jnp.float32)
    # PyTorch Linear weight layout: (out_features, in_features)
    w1 = jax.random.normal(k_w1, (hid, C), dtype=jnp.float32) * 0.1
    b1 = jax.random.normal(k_b1, (hid,), dtype=jnp.float32) * 0.1
    w2 = jax.random.normal(k_w2, (C, hid), dtype=jnp.float32) * 0.1
    b2 = jax.random.normal(k_b2, (C,), dtype=jnp.float32) * 0.1

    att, out = cam_forward(x, w1, b1, w2, b2, ret_att=True)
    out = jax.block_until_ready(out)
    att = jax.block_until_ready(att)

    ref = reference_cam(x, w1, b1, w2, b2)
    assert out.shape == (B, C, H, W)
    assert att.shape == (B, C, 1, 1)
    assert jnp.allclose(out, ref, atol=1e-5, rtol=1e-5), "mismatch vs reference"

    print("KERNEL_OK")
</pallas_src>

<mosaic_0001>
module attributes {stable_mosaic.version = 11 : i64} {
  func.func @_cam_pool_mlp_kernel(%arg0: i32, %arg1: i32, %arg2: memref<1x4x256xf32, #tpu.memory_space<vmem>>, %arg3: memref<4x2xf32, #tpu.memory_space<vmem>>, %arg4: memref<1x2xf32, #tpu.memory_space<vmem>>, %arg5: memref<2x4xf32, #tpu.memory_space<vmem>>, %arg6: memref<1x4xf32, #tpu.memory_space<vmem>>, %arg7: memref<1x1x4xf32, #tpu.memory_space<vmem>>, %arg8: memref<1x4x128xf32, #tpu.memory_space<vmem>>, %arg9: memref<1x4x128xf32, #tpu.memory_space<vmem>>) attributes {dimension_semantics = [#tpu.dimension_semantics<parallel>, #tpu.dimension_semantics<arbitrary>], iteration_bounds = array<i64: 2, 1>, scalar_prefetch = 0 : i64, scratch_operands = 2 : i64, tpu.core_type = #tpu.core_type<tc>, window_params = [{transform_indices = @transform_0, window_bounds = array<i64: 1, 4, 256>}, {pipeline_mode = #tpu.pipeline_mode<synchronous>, transform_indices = @transform_1, window_bounds = array<i64: 4, 2>}, {pipeline_mode = #tpu.pipeline_mode<synchronous>, transform_indices = @transform_2, window_bounds = array<i64: 1, 2>}, {pipeline_mode = #tpu.pipeline_mode<synchronous>, transform_indices = @transform_3, window_bounds = array<i64: 2, 4>}, {pipeline_mode = #tpu.pipeline_mode<synchronous>, transform_indices = @transform_4, window_bounds = array<i64: 1, 4>}, {transform_indices = @transform_5, window_bounds = array<i64: 1, 1, 4>}]} {
    %c0_i32 = arith.constant 0 : i32
    %0 = arith.cmpi eq, %arg1, %c0_i32 : i32
    %1 = arith.extui %0 : i1 to i32
    %c0_i32_0 = arith.constant 0 : i32
    %2 = arith.cmpi ne, %1, %c0_i32_0 : i32
    scf.if %2 {
      %cst = arith.constant 0xFF800000 : f32
      %17 = vector.broadcast %cst : f32 to vector<1x4x128xf32>
      %c0_17 = arith.constant 0 : index
      %c0_18 = arith.constant 0 : index
      %c0_19 = arith.constant 0 : index
      %18 = vector.load %arg8[%c0_17, %c0_18, %c0_19] : memref<1x4x128xf32, #tpu.memory_space<vmem>>, vector<1x4x128xf32>
      tpu.vector_store %arg8[%c0_17, %c0_18, %c0_19], %17 {strides = array<i32>} : memref<1x4x128xf32, #tpu.memory_space<vmem>>, vector<1x4x128xf32>,
      %cst_20 = arith.constant 0.000000e+00 : f32
      %19 = vector.broadcast %cst_20 : f32 to vector<1x4x128xf32>
      %c0_21 = arith.constant 0 : index
      %c0_22 = arith.constant 0 : index
      %c0_23 = arith.constant 0 : index
      %20 = vector.load %arg9[%c0_21, %c0_22, %c0_23] : memref<1x4x128xf32, #tpu.memory_space<vmem>>, vector<1x4x128xf32>
      tpu.vector_store %arg9[%c0_21, %c0_22, %c0_23], %19 {strides = array<i32>} : memref<1x4x128xf32, #tpu.memory_space<vmem>>, vector<1x4x128xf32>,
    } else {
    }
    %c0 = arith.constant 0 : index
    %c0_1 = arith.constant 0 : index
    %c0_2 = arith.constant 0 : index
    %3 = vector.load %arg2[%c0, %c0_1, %c0_2] : memref<1x4x256xf32, #tpu.memory_space<vmem>>, vector<1x4x256xf32>
    %c0_3 = arith.constant 0 : index
    %c0_4 = arith.constant 0 : index
    %c0_5 = arith.constant 0 : index
    %4 = vector.load %arg8[%c0_3, %c0_4, %c0_5] : memref<1x4x128xf32, #tpu.memory_space<vmem>>, vector<1x4x128xf32>
    %c0_6 = arith.constant 0 : index
    %c0_7 = arith.constant 0 : index
    %c0_8 = arith.constant 0 : index
    %5 = vector.load %arg9[%c0_6, %c0_7, %c0_8] : memref<1x4x128xf32, #tpu.memory_space<vmem>>, vector<1x4x128xf32>
    %6 = vector.extract_strided_slice %3 {offsets = [0, 0, 0], sizes = [1, 4, 128], strides = [1, 1, 1]} : vector<1x4x256xf32> to vector<1x4x128xf32>
    %7 = arith.maximumf %4, %6 : vector<1x4x128xf32>
    %8 = arith.addf %5, %6 : vector<1x4x128xf32>
    %9 = vector.extract_strided_slice %3 {offsets = [0, 0, 128], sizes = [1, 4, 128], strides = [1, 1, 1]} : vector<1x4x256xf32> to vector<1x4x128xf32>
    %10 = arith.maximumf %7, %9 : vector<1x4x128xf32>
    %11 = arith.addf %8, %9 : vector<1x4x128xf32>
    %c0_9 = arith.constant 0 : index
    %c0_10 = arith.constant 0 : index
    %c0_11 = arith.constant 0 : index
    %12 = vector.load %arg8[%c0_9, %c0_10, %c0_11] : memref<1x4x128xf32, #tpu.memory_space<vmem>>, vector<1x4x128xf32>
    tpu.vector_store %arg8[%c0_9, %c0_10, %c0_11], %10 {strides = array<i32>} : memref<1x4x128xf32, #tpu.memory_space<vmem>>, vector<1x4x128xf32>,
    %c0_12 = arith.constant 0 : index
    %c0_13 = arith.constant 0 : index
    %c0_14 = arith.constant 0 : index
    %13 = vector.load %arg9[%c0_12, %c0_13, %c0_14] : memref<1x4x128xf32, #tpu.memory_space<vmem>>, vector<1x4x128xf32>
    tpu.vector_store %arg9[%c0_12, %c0_13, %c0_14], %11 {strides = array<i32>} : memref<1x4x128xf32, #tpu.memory_space<vmem>>, vector<1x4x128xf32>,
    %c0_i32_15 = arith.constant 0 : i32
    %14 = arith.cmpi eq, %arg1, %c0_i32_15 : i32
    %15 = arith.extui %14 : i1 to i32
    %c0_i32_16 = arith.constant 0 : i32
    %16 = arith.cmpi ne, %15, %c0_i32_16 : i32
    scf.if %16 {
      %c0_17 = arith.constant 0 : index
      %c0_18 = arith.constant 0 : index
      %c0_19 = arith.constant 0 : index
      %17 = vector.load %arg8[%c0_17, %c0_18, %c0_19] : memref<1x4x128xf32, #tpu.memory_space<vmem>>, vector<1x4x128xf32>
      %cst = arith.constant dense<0xFF800000> : vector<1x4xf32>
      %18 = vector.multi_reduction <maximumf>, %17, %cst [2] : vector<1x4x128xf32> to vector<1x4xf32>
      %c0_20 = arith.constant 0 : index
      %c0_21 = arith.constant 0 : index
      %c0_22 = arith.constant 0 : index
      %19 = vector.load %arg9[%c0_20, %c0_21, %c0_22] : memref<1x4x128xf32, #tpu.memory_space<vmem>>, vector<1x4x128xf32>
      %cst_23 = arith.constant dense<0.000000e+00> : vector<1x4xf32>
      %20 = vector.multi_reduction <add>, %19, %cst_23 [2] : vector<1x4x128xf32> to vector<1x4xf32>
      %cst_24 = arith.constant 3.906250e-03 : f32
      %21 = vector.broadcast %cst_24 : f32 to vector<1x4xf32>
      %22 = arith.mulf %20, %21 : vector<1x4xf32>
      %23 = tpu.concatenate %18, %22 in 0 : vector<1x4xf32>, vector<1x4xf32> -> vector<2x4xf32>
      %c0_25 = arith.constant 0 : index
      %c0_26 = arith.constant 0 : index
      %24 = vector.load %arg3[%c0_25, %c0_26] : memref<4x2xf32, #tpu.memory_space<vmem>>, vector<4x2xf32>
      %cst_27 = arith.constant dense<0.000000e+00> : vector<2x2xf32>
      %25 = tpu.matmul %23, %24, %cst_27 {dimension_numbers = #tpu.dot_dimension_numbers<[1], [0], [0], [1], [0, 0, 1, 1], [], []>} : vector<2x4xf32>, vector<4x2xf32>, vector<2x2xf32> -> vector<2x2xf32>
      %c0_28 = arith.constant 0 : index
      %c0_29 = arith.constant 0 : index
      %26 = vector.load %arg4[%c0_28, %c0_29] : memref<1x2xf32, #tpu.memory_space<vmem>>, vector<1x2xf32>
      %27 = vector.broadcast %26 : vector<1x2xf32> to vector<2x2xf32>
      %28 = arith.addf %25, %27 : vector<2x2xf32>
      %cst_30 = arith.constant 0.000000e+00 : f32
      %29 = vector.broadcast %cst_30 : f32 to vector<2x2xf32>
      %30 = arith.cmpf ogt, %28, %29 : vector<2x2xf32>
      %cst_31 = arith.constant 0.00999999977 : f32
      %31 = vector.broadcast %cst_31 : f32 to vector<2x2xf32>
      %32 = arith.mulf %31, %28 : vector<2x2xf32>
      %33 = arith.select %30, %28, %32 : vector<2x2xi1>, vector<2x2xf32>
      %34 = vector.extract_strided_slice %33 {offsets = [0, 0], sizes = [1, 2], strides = [1, 1]} : vector<2x2xf32> to vector<1x2xf32>
      %35 = vector.extract_strided_slice %33 {offsets = [1, 0], sizes = [1, 2], strides = [1, 1]} : vector<2x2xf32> to vector<1x2xf32>
      %36 = arith.addf %34, %35 : vector<1x2xf32>
      %c0_32 = arith.constant 0 : index
      %c0_33 = arith.constant 0 : index
      %37 = vector.load %arg5[%c0_32, %c0_33] : memref<2x4xf32, #tpu.memory_space<vmem>>, vector<2x4xf32>
      %cst_34 = arith.constant dense<0.000000e+00> : vector<1x4xf32>
      %38 = tpu.matmul %36, %37, %cst_34 {dimension_numbers = #tpu.dot_dimension_numbers<[1], [0], [0], [1], [0, 0, 1, 1], [], []>} : vector<1x2xf32>, vector<2x4xf32>, vector<1x4xf32> -> vector<1x4xf32>
      %c0_35 = arith.constant 0 : index
      %c0_36 = arith.constant 0 : index
      %39 = vector.load %arg6[%c0_35, %c0_36] : memref<1x4xf32, #tpu.memory_space<vmem>>, vector<1x4xf32>
      %40 = arith.addf %38, %39 : vector<1x4xf32>
      %41 = arith.negf %40 : vector<1x4xf32>
      %42 = math.exp %41 : vector<1x4xf32>
      %cst_37 = arith.constant 1.000000e+00 : f32
      %43 = vector.broadcast %cst_37 : f32 to vector<1x4xf32>
      %44 = arith.addf %43, %42 : vector<1x4xf32>
      %45 = arith.divf %43, %44 : vector<1x4xf32>
      %c0_38 = arith.constant 0 : index
      %c0_39 = arith.constant 0 : index
      %c0_40 = arith.constant 0 : index
      %46 = vector.load %arg7[%c0_38, %c0_39, %c0_40] : memref<1x1x4xf32, #tpu.memory_space<vmem>>, vector<1x1x4xf32>
      %47 = vector.shape_cast %46 : vector<1x1x4xf32> to vector<1x4xf32>
      %48 = vector.shape_cast %45 : vector<1x4xf32> to vector<1x1x4xf32>
      tpu.vector_store %arg7[%c0_38, %c0_39, %c0_40], %48 {strides = array<i32>} : memref<1x1x4xf32, #tpu.memory_space<vmem>>, vector<1x1x4xf32>,
    } else {
    }
    return
  }
  func.func @transform_0(%arg0: i32, %arg1: i32) -> (i32, i32, i32) {
    %c0_i32 = arith.constant 0 : i32
    %c0_i32_0 = arith.constant 0 : i32
    return %arg0, %c0_i32, %arg1 : i32, i32, i32
  }
  func.func @transform_1(%arg0: i32, %arg1: i32) -> (i32, i32) {
    %c0_i32 = arith.constant 0 : i32
    %c0_i32_0 = arith.constant 0 : i32
    %c0_i32_1 = arith.constant 0 : i32
    return %c0_i32, %c0_i32_0 : i32, i32
  }
  func.func @transform_2(%arg0: i32, %arg1: i32) -> (i32, i32) {
    %c0_i32 = arith.constant 0 : i32
    %c0_i32_0 = arith.constant 0 : i32
    %c0_i32_1 = arith.constant 0 : i32
    return %c0_i32, %c0_i32_0 : i32, i32
  }
  func.func @transform_3(%arg0: i32, %arg1: i32) -> (i32, i32) {
    %c0_i32 = arith.constant 0 : i32
    %c0_i32_0 = arith.constant 0 : i32
    %c0_i32_1 = arith.constant 0 : i32
    return %c0_i32, %c0_i32_0 : i32, i32
  }
  func.func @transform_4(%arg0: i32, %arg1: i32) -> (i32, i32) {
    %c0_i32 = arith.constant 0 : i32
    %c0_i32_0 = arith.constant 0 : i32
    %c0_i32_1 = arith.constant 0 : i32
    return %c0_i32, %c0_i32_0 : i32, i32
  }
  func.func @transform_5(%arg0: i32, %arg1: i32) -> (i32, i32, i32) {
    %c0_i32 = arith.constant 0 : i32
    %c0_i32_0 = arith.constant 0 : i32
    %c0_i32_1 = arith.constant 0 : i32
    return %arg0, %c0_i32, %c0_i32_0 : i32, i32, i32
  }
}

</mosaic_0001>

<bundles_post_ra>
// kernel: tpu_custom_call.1
= control target key start
LH: loop header
LB: loop body
LE: loop exit
PB: predicated region body
PF: predicated region fallthrough
CT: control target
= control target key end

     0   :  { %10 = vsyncpa [#allocation5], 0  ;;  %s1011_s0 = inlined_call_operand.hbm [shape: f32[2,4,256], index: 0, kind: input, shape index: {}]   ;;  %s1012_s1 = inlined_call_operand.vmem [shape: f32[4,2], index: 1, kind: input, shape index: {}]   ;;  %s1013_s2 = inlined_call_operand.vmem [shape: f32[1,2], index: 2, kind: input, shape index: {}]   ;;  %s1014_s3 = inlined_call_operand.vmem [shape: f32[2,4], index: 3, kind: input, shape index: {}]   ;;  %s1015_s4 = inlined_call_operand.vmem [shape: f32[1,4], index: 4, kind: input, shape index: {}]   ;;  %s1016_s5 = inlined_call_operand.hbm [shape: f32[2,1,4], index: 5, kind: output, shape index: {}]  }
   0x1   :  { %12 = vsyncpa [#allocation5 + $0x1], 0 }
   0x2   :  { %13 = vsyncpa [#allocation6], 0 }
   0x3   :  { %15 = vsyncpa [#allocation6 + $0x1], 0  ;;  %s826_s18 = smov 0   ;;  %s828_s19 = smov 0  }
   0x4   :  { %s830_s20 = smov 0   ;;  %s832_s21 = smov 0  }
   0x5   :  { %s834_s22 = smov 0   ;;  %s836_s23 = smov 0  }
   0x6 LB: > { %s574_s24 = sadd.s32 4294967295, %s789_s23   ;;  %s575_s25 = sadd.s32 4294967294, %s789_s23   ;;  %s789_s23 = sphi %s836_s23, %s21_s23   ;;  %s785_s22 = sphi %s834_s22, %s1032_s22   ;;  %s781_s21 = sphi %s832_s21, %s1031_s21   ;;  %s777_s20 = sphi %s830_s20, %s1030_s20   ;;  %s773_s19 = sphi %s828_s19, %s1029_s19   ;;  %s769_s18 = sphi %s826_s18, %s1028_s18  }
   0x7   : > { %s33_s26 = sadd.s32 1, %s785_s22  ;;  %s42_s27 = sadd.s32 1, %s777_s20 }
   0x8   : > { %p35_p0 = scmp.ge.s32.totalorder %s33_s26, 2  ;;  %p49_p1 = scmp.ne.s32.totalorder %s777_s20, %s773_s19 }
   0x9   : > { %p50_p2 = scmp.eq.s32.totalorder %s789_s23, 0  ;;  %p55_p3 = scmp.ne.s32.totalorder %s773_s19, %s769_s18 }
   0xa   : > { %s1034_s26 = smov (%p35_p0, %s33_s26), 0  ;;  %p56_p5 = scmp.eq.s32.totalorder %s574_s24, 0 }
   0xb   : > { %p867_p4 = por %p50_p2, %p49_p1  ;;  %s37_s29 = ssub.s32 %s785_s22, %s1034_s26 }
   0xc   : > { %p163_p6 = scmp.eq.s32.totalorder %s574_s24, 1  ;;  %p40_p7 = scmp.eq.s32.totalorder %s37_s29, 0 }
   0xd   : > { %p873_p8 = por %p56_p5, %p55_p3  ;;  %p169_p10 = scmp.eq.s32.totalorder %s575_s25, 1 }
   0xe   : > { %p877_p9 = por %p163_p6, %p49_p1  ;;  %p619_p13 = scmp.lt.s32.totalorder %s789_s23, 2 }
   0xf   : > { %s882_s7 = scalar_select %p40_p7, %s777_s20, %s42_s27  }
  0x10   : > { %s1020_s6 = scalar_select %p877_p9, 1, 0 }
  0x11   : > { %p884_p11 = por %p169_p10, %p55_p3  ;;  %s201_s9 = sand.u32 1, %s777_s20  }
  0x12   : > { %s578_s10 = sshll.u32 %s201_s9, 3  ;;  %s592_s11 = sshll.u32 %s785_s22, 7 }
  0x13   : > { %s1021_s8 = scalar_select %p884_p11, 1, 0 }
  0x14   : > { %s895_s14 = scalar_lea.hbm %s1011_s0, %s592_s11  ;;  %s205_s15 = scalar_lea.vmem [#allocation4], %s578_s10 }
  0x15   : > { %s215_s16 = sshll.u32 %s205_s15, 4  ;;  %p901_p0 = pnand %p619_p13, %p867_p4  ;;  %s897_s16 = int_to_ptr.vmem [resolvable:$true] %s215_s16 }
  0x16   : > { %s202_s24 = scalar_lea.sflag [#allocation5], %s201_s9  ;;  %s677_s25 = scalar_lea.hbm %s895_s14, 128 }
  0x17   : > { %p678_p3 = scmp.ne.s32.totalorder %s895_s14, %s677_s25  ;;  %p679_p5 = pneg %p901_p0 }
  0x18   : > { %s682_s28 = scalar_lea.hbm %s1011_s0, 256  ;;  %p683_p4 = scmp.lt.u32.totalorder %s895_s14, %s1011_s0 }
  0x19   : > { %p680_p6 = pnand %p679_p5, %p678_p3  ;;  %p684_p10 = scmp.lt.u32.totalorder %s682_s28, %s677_s25 }
  0x1a   : > { %p686_p12 = scmp.lt.u32.totalorder %s677_s25, %s895_s14 }
  0x1b   : > { %p681_p7 = pneg %p680_p6  ;;  %p685_p13 = por %p684_p10, %p683_p4 }
  0x1d   : > { %p687_p1 = por %p686_p12, %p685_p13 }
  0x1f   : > { %p688_p2 = pnand %p687_p1, %p681_p7 }
  0x21   : > { %691 = shalt.err (!%p688_p2)
}
  0x22   : > { %s692_s9 = scalar_lea.vmem %s897_s16, 128  ;;  %s791_s12 = smov [#allocation4]  }
  0x23   : > { %p693_p3 = scmp.ne.s32.totalorder %s897_s16, %s692_s9  ;;  %s697_s13 = sshll.u32 %s791_s12, 4  ;;  %s698_s13 = int_to_ptr.vmem [resolvable:$false] %s697_s13 }
  0x24   : > { %s699_s15 = scalar_lea.vmem %s698_s13, 256  ;;  %p700_p9 = scmp.lt.s32.totalorder %s897_s16, %s698_s13 }
  0x25   : > { %p695_p6 = pnand %p693_p3, %p679_p5  ;;  %p701_p4 = scmp.lt.s32.totalorder %s699_s15, %s692_s9 }
  0x27   : > { %p696_p11 = pneg %p695_p6  ;;  %p702_p10 = por %p701_p4, %p700_p9 }
  0x29   : > { %p703_p12 = pnand %p702_p10, %p696_p11 }
  0x2b   : > { %706 = shalt.err (!%p703_p12)
}
  0x2c   : > { %614 = dma.hbm_to_vmem [thread:$0]  (!%p901_p0), %s895_s14, 128, %s897_s16, %s202_s24  }
  0x2d   : > { %p1023_p1 = scmp.lt.s32.totalorder %s789_s23, 3  ;;  %p1024_p2 = scmp.ge.s32.totalorder %s789_s23, 1 }
  0x2f   : > { %p221_p5 = pnand %p1024_p2, %p1023_p1 }
  0x30   : > { %s937_s25 = sand.u32 (!%p221_p5), 1, %s773_s19  }
  0x31   : > { %224 = sbr.rel (%p221_p5) target bundleno = 703 (0x2bf), region = 40  ;;  %s582_s27 = sshll.u32 (!%p221_p5), %s937_s25, 3 }
  0x32   : > { %s227_s29 = scalar_lea.sflag (!%p221_p5), [#allocation5], %s937_s25  ;;  %s230_s28 = scalar_lea.vmem (!%p221_p5), [#allocation4], %s582_s27 }
  0x38   : > { %760 = dma.done.wait (%p873_p8), %s227_s29, 128  }
  0x39   : > { %762 = vsyncadd (%p873_p8), %s227_s29, 4294967168  ;;  %v792_v0 = vmov 0.0   ;;  %v793_v1 = vmov -inf   ;;  %v263_v2 = vld [vmem:[%s230_s28] sm:$0xff]  ;;  %vm279_vm0 = vcmask 1043456   ;;  %vm794_vm1 = vmmov 0  }
  0x3a   : > { %262 = vst [vmem:[#allocation3] sm:$0xf] %v792_v0  ;;  %261 = vst [vmem:[#allocation2] sm:$0xf] %v793_v1  ;;  %597 = vmatprep.subr.mxu0 %v792_v0  ;;  %602 = vmatprep.subr.mxu1 %v792_v0  ;;  %v269_v4 = vcombine.high %v263_v2, %v263_v2  ;;  %v304_v14 = vld [vmem:[%s1012_s1] sm:$0xf]  ;;  %v289_v15 = vlaneseq }
  0x3b   : > { %598 = vmatpush3.msk.msra.mxu0 %vm279_vm0, %v304_v14  ;;  %599 = vmatprep.mubr.msk.f32.mxu0 %vm794_vm1, %v792_v0  ;;  %vm302_vm2 = vcmask 1040384   ;;  %vm312_vm3 = vcmask 31744   ;;  %v396_v25 = vld [vmem:[%s1014_s3] sm:$0x3]  ;;  %vm402_vm4 = vcmask 1041408   ;;  %vm398_vm6 = vcmask 15360  }
  0x3c   : > { %604 = vmatprep.mubr.msk.f32.mxu1 %vm794_vm1, %v792_v0  ;;  %v290_v16 = vand.u32 127, %v289_v15  ;;  %v292_v17 = vshrl.u32 %v289_v15, 7  ;;  %603 = vmatpush3.msk.msra.mxu1 %vm402_vm4, %v396_v25  ;;  %v583_v26 = vld [vmem:[%s1013_s2] ss:$0 sm:$0xff]  ;;  %s589_s12 = sshll.u32 %s781_s21, 4  ;;  %s255_s13 = scalar_lea.vmem [#allocation7], %s937_s25 }
  0x3d   : > { %v397_v34 = vld [vmem:[%s1015_s4] sm:$0x1]  ;;  %s497_s15 = sshll.u32 %s255_s13, 4  ;;  %vm482_vm7 = vcmask 24576   ;;  %s962_s28 = scalar_lea.hbm %s1016_s5, %s589_s12  ;;  %s964_s15 = int_to_ptr.vmem [resolvable:$true] %s497_s15 }
  0x3e   : > { %v293_v19 = vsub.s32 %v290_v16, %v292_v17  ;;  %s485_s30 = scalar_lea.sflag [#allocation6], %s937_s25  ;;  %s707_s14 = scalar_lea.vmem %s964_s15, 16 }
  0x3f   : > { %p708_p8 = scmp.ne.s32.totalorder %s964_s15, %s707_s14  ;;  %p1025_p9 = scmp.ne.s32.totalorder %s1020_s6, 0 }
  0x40   : > { %s795_s21 = smov [#allocation7]  }
  0x41   : > { %v265_v3 = vld [vmem:[#allocation3] sm:$0xf]  ;;  %v264_v5 = vld [vmem:[#allocation2] sm:$0xf]  ;;  %p709_p11 = pnand %p708_p8, %p1025_p9  ;;  %s711_s16 = sshll.u32 %s795_s21, 4  ;;  %s712_s16 = int_to_ptr.vmem [resolvable:$false] %s711_s16 }
  0x42   : > { %v267_v6 = vadd.f32 %v265_v3, %v263_v2  ;;  %v266_v7 = vmax.f32 %v264_v5, %v263_v2  ;;  %s713_s17 = scalar_lea.vmem %s712_s16, 32  ;;  %p714_p7 = scmp.lt.s32.totalorder %s964_s15, %s712_s16 }
  0x43   : > { %p710_p0 = pneg %p709_p11  ;;  %p715_p13 = scmp.lt.s32.totalorder %s713_s17, %s707_s14 }
  0x44   : > { %v272_v8 = vadd.f32 %v269_v4, %v267_v6  ;;  %v271_v9 = vmax.f32 %v266_v7, %v269_v4 }
  0x45   : > { %p716_p3 = por %p715_p13, %p714_p7 }
  0x46   : > { %274 = vst [vmem:[#allocation3] sm:$0xf] %v272_v8  ;;  %273 = vst [vmem:[#allocation2] sm:$0xf] %v271_v9 }
  0x47   : > { %p717_p6 = pnand %p716_p3, %p710_p0 }
  0x4d   : > { %v283_v10 = vld [vmem:[#allocation3] sm:$0xf]  ;;  %v278_v11 = vld [vmem:[#allocation2] sm:$0xf] }
  0x4e   : > { %v284_v12 = vsel %vm279_vm0, %v283_v10, 0.0  ;;  %v280_v13 = vsel %vm279_vm0, %v278_v11, -inf }
  0x4f   : > { %285 = vadd.xlane.f32.xlu0 %v284_v12 }
  0x53   : > { %281 = vmax.xlane.f32.xlu0 %v280_v13 }
  0xdc   : > { %v286_v18 = vpop.xlane.xlu0 %285 }
  0xdd   : > { %v287_v20 = vmul.f32 0.00390625, %v286_v18 }
  0xdf   : > { %v300_v22 = vrot.slane %v287_v20, %v293_v19 }
  0xe0   : > { %v282_v21 = vpop.xlane.xlu0 %281 }
  0xe1   : > { %v294_v23 = vrot.slane %v282_v21, %v293_v19 }
  0xe3   : > { %v303_v24 = vsel %vm302_vm2, %v294_v23, %v300_v22 }
  0xe4   : > { %600 = vmatmul.mubr.msk.f32.vlgmr.msra.gmra.mrb[0].mxu0 %vm312_vm3, %v303_v24 }
 0x1b7   : > { %v385_v27 = vpop.f32.mrb[0].mxu0 }
 0x1b8   : > { %v386_v28 = vadd.f32 %v583_v26, %v385_v27  ;;  %v601_v29 = vpop.f32.mrb[1].mxu0 }
 0x1ba   : > { %vm389_vm5 = vcmp.gt.f32.partialorder %v386_v28, 0.0  ;;  %v390_v30 = vmul.f32 0.01, %v386_v28 }
 0x1bc   : > { %v391_v31 = vsel %vm389_vm5, %v386_v28, %v390_v30 }
 0x1bd   : > { %v393_v32 = vrot.slane %v391_v31, 1 }
 0x1bf   : > { %v395_v33 = vadd.f32 %v393_v32, %v391_v31 }
 0x1c1   : > { %605 = vmatmul.mubr.msk.f32.vlgmr.msra.gmra.mrb[0].mxu1 %vm398_vm6, %v395_v33 }
 0x294   : > { %v472_v35 = vpop.f32.mrb[0].mxu1 }
 0x295   : > { %v473_v36 = vadd.f32 %v472_v35, %v397_v34  ;;  %v606_v37 = vpop.f32.mrb[1].mxu1 }
 0x297   : > { %v588_v38 = vmul.f32 -1.442695, %v473_v36 }
 0x299   : > { %673 = vpow2.f32 %v588_v38 }
 0x2a3   : > { %v674_v39 = vpop.eup %673 }
 0x2a4   : > { %v479_v40 = vadd.f32 1.0, %v674_v39 }
 0x2a6   : > { %675 = vrcp.f32 %v479_v40 }
 0x2b0   : > { %v676_v41 = vpop.eup %675 }
 0x2b1   : > { %483 = vst.msk [vmem:[%s255_s13] sm:$0x1] %vm482_vm7, %v676_v41 }
 0x2b2   : > { %720 = shalt.err (!%p717_p6)
}
 0x2b3   : > { %s721_s25 = scalar_lea.hbm %s962_s28, 16  ;;  %s725_s11 = scalar_lea.hbm %s1016_s5, 32 }
 0x2b4   : > { %p722_p4 = scmp.ne.s32.totalorder %s962_s28, %s721_s25  ;;  %p726_p1 = scmp.lt.u32.totalorder %s962_s28, %s1016_s5 }
 0x2b5   : > { %p727_p2 = scmp.lt.u32.totalorder %s725_s11, %s721_s25  ;;  %p729_p8 = scmp.lt.u32.totalorder %s721_s25, %s962_s28 }
 0x2b6   : > { %p723_p10 = pnand %p722_p4, %p1025_p9 }
 0x2b7   : > { %p728_p5 = por %p727_p2, %p726_p1 }
 0x2b8   : > { %p724_p12 = pneg %p723_p10 }
 0x2b9   : > { %p730_p11 = por %p729_p8, %p728_p5 }
 0x2bb   : > { %p731_p0 = pnand %p730_p11, %p724_p12 }
 0x2bd   : > { %734 = shalt.err (!%p731_p0)
}
 0x2be   : > { %609 = dma.vmem_to_hbm [thread:$0]  (%p1025_p9), %s964_s15, 16, %s962_s28, %s485_s30  }
 0x2bf PF: > { %s509_s13 = sand.u32 1, %s769_s18   ;;  %p1026_p7 = scmp.ne.s32.totalorder %s1021_s8, 0 }
 0x2c0   : > { %p1027_p13 = scmp.ge.s32.totalorder %s789_s23, 2  ;;  %s510_s27 = scalar_lea.sflag [#allocation6], %s509_s13 }
 0x2c2   : > { %p616_p3 = pnand %p1027_p13, %p1026_p7 }
 0x2c4   : > { %764 = dma.done.wait (!%p616_p3), %s510_s27, 16  }
 0x2c5   : > { %766 = vsyncadd (!%p616_p3), %s510_s27, 4294967280  ;;  %s21_s23 = sadd.s32 1, %s789_s23   ;;  %s1028_s18 = smov %s773_s19 }
 0x2c6   : > { %p18_p6 = scmp.ge.s32.totalorder %s21_s23, 4   ;;  %s1029_s19 = smov %s777_s20 }
 0x2c7   : > { %s1030_s20 = smov %s882_s7  ;;  %s1031_s21 = smov %s785_s22 }
 0x2c8   : > { %s1032_s22 = smov %s1034_s26  ;;  %20 = sbr.rel (!%p18_p6) target bundleno = 6 (0x6), region = 93 }
 0x2cf   :  { %514 = vsyncpa [#allocation5], 1 }
 0x2d0   :  { %516 = vsyncpa [#allocation5 + $0x1], 1 }
 0x2d1   :  { %517 = vsyncpa [#allocation6], 1 }
 0x2d2   :  { %519 = vsyncpa [#allocation6 + $0x1], 1 }

</bundles_post_ra>
